<compile_context>
chip_gen: v6e
topology: v6e:2x2x1
jax: 0.10.0
libtpu: 0.0.40
codegen_flags: <defaults>
</compile_context>

<pallas_src>
import math

import jax
import jax.numpy as jnp
from jax.experimental import pallas as pl
from jax.experimental.pallas import tpu as pltpu

# ----------------------------- model config ---------------------------------
B = 2          # batch
T = 8          # sequence length
C = 32         # n_embd
N_HEAD = 4     # n_head
HEAD_DIM = C // N_HEAD
BLOCK_EXP = 4
HID = BLOCK_EXP * C
EPS = 1e-6     # matches nn.LayerNorm(n_embd, eps=1e-06)
LANES = 128    # every weight/bias padded to 128 output lanes


def _norm(z):
    # LayerNorm statistics only — gamma/beta are folded into the following
    # linear layers at trace time (see transformer_block).
    mu = jnp.mean(z, axis=-1, keepdims=True)
    var = jnp.mean((z - mu) ** 2, axis=-1, keepdims=True)
    return (z - mu) * jax.lax.rsqrt(var + EPS)


# ------------------------------ the kernel ----------------------------------
def block_kernel(x_ref, w_ref, wp_ref, b_ref, o_ref):
    f32 = jnp.float32
    bf16 = jnp.bfloat16

    x = x_ref[...]                                        # (B*T, C) f32

    # ---- attention branch: x + attn(ln1(x)) ----
    h = _norm(x).astype(bf16)
    # ln1 affine and the 1/sqrt(D) query scale are pre-folded into wqkv/bqkv.
    qkv = jnp.dot(h, w_ref[0:C, :],
                  preferred_element_type=f32) + b_ref[0:1, :]          # (B*T, 128)

    def gather_heads(base):
        # lane chunks -> batched (N_HEAD*B, T, D); batch index n = hd*B + b.
        chunks = [qkv[:, base + hd * HEAD_DIM: base + (hd + 1) * HEAD_DIM]
                  .reshape(B, T, HEAD_DIM) for hd in range(N_HEAD)]
        return jnp.concatenate(chunks, axis=0)

    q = gather_heads(0 * C).astype(bf16)                  # (H*B, T, D)
    k = gather_heads(1 * C).astype(bf16)
    v = gather_heads(2 * C).astype(bf16)

    att = jnp.einsum('nqd,nkd->nqk', q, k,
                     preferred_element_type=f32)          # (H*B, T, T)
    att = att - jnp.max(att, axis=-1, keepdims=True)
    p = jnp.exp(att)
    # Approximate EUP reciprocal (~1e-3 rel error): fine for inference numerics.
    p = p * pl.reciprocal(jnp.sum(p, axis=-1, keepdims=True), approx=True)
    y = jnp.einsum('nqk,nkd->nqd', p.astype(bf16), v,
                   preferred_element_type=f32)            # (H*B, T, D)

    # Output projection fused with the head merge:  sum_h  y_h @ Wp[h]
    y_h = y.reshape(N_HEAD, B * T, HEAD_DIM).astype(bf16)  # tile-preserving reshape
    attn_out = jnp.einsum('hnd,hdc->hnc', y_h, wp_ref[...],
                          preferred_element_type=f32)      # (H, B*T, C)
    attn_out = jnp.sum(attn_out, axis=0) + b_ref[1:2, 0:C]  # (B*T, C)

    x = x + attn_out                                      # residual 1

    # ---- MLP branch: x + mlp(ln2(x)) ----
    h2 = _norm(x).astype(bf16)                            # ln2 affine folded into w1/b1
    m = jnp.dot(h2, w_ref[C:2 * C, :],
                preferred_element_type=f32) + b_ref[2:3, :]            # (B*T, HID)
    m = jnp.maximum(m, 0.0).astype(bf16)                  # ReLU
    m = jnp.dot(m, w_ref[2 * C:2 * C + HID, 0:C],
                preferred_element_type=f32) + b_ref[3:4, 0:C]

    # TODO(synk): output last dim is 32 (<128 lanes -> masked store); negligible
    # at B*T=16, revisit with a lane-dense carried layout if blocks are chained.
    o_ref[...] = x + m                                    # residual 2


# ------------------------------ the wrapper ---------------------------------
def transformer_block(x, params):
    (ln1w, ln1b, wq, bq, wk, bk, wv, bv, wp, bp,
     ln2w, ln2b, w1, b1, w2, b2) = params

    f32 = jnp.float32
    bf16 = jnp.bfloat16
    scale = 1.0 / math.sqrt(HEAD_DIM)

    # ---- trace-time folds: LN affines + attention scale into the weights ----
    g1, beta1 = ln1w.reshape(C, 1), ln1b.reshape(1, C)
    wqkv = jnp.concatenate([g1 * wq * scale, g1 * wk, g1 * wv], axis=1)   # (C, 3C)
    bqkv = jnp.concatenate([(beta1 @ wq + bq) * scale,
                            beta1 @ wk + bk,
                            beta1 @ wv + bv], axis=1)                     # (1, 3C)

    g2, beta2 = ln2w.reshape(C, 1), ln2b.reshape(1, C)
    w1_f = g2 * w1                                                        # (C, HID)
    b1_f = beta2 @ w1 + b1                                                # (1, HID)

    def pad_lanes(w):
        return jnp.pad(w, ((0, 0), (0, LANES - w.shape[1])))

    # One lane-dense bf16 weight slab: rows [0:C]=wqkv, [C:2C]=w1, [2C:2C+HID]=w2.
    w_slab = jnp.concatenate(
        [pad_lanes(wqkv), pad_lanes(w1_f), pad_lanes(w2)],
        axis=0).astype(bf16)                                              # (192, 128)

    # Per-head output-projection weight for the fused head-merge einsum.
    wp_h = wp.reshape(N_HEAD, HEAD_DIM, C).astype(bf16)                   # (H, D, C)

    # One f32 bias slab: row0=bqkv, row1=bp, row2=b1, row3=b2 (rest zero).
    b_slab = jnp.zeros((8, LANES), f32)
    b_slab = b_slab.at[0, :3 * C].set(bqkv[0])
    b_slab = b_slab.at[1, :C].set(bp[0])
    b_slab = b_slab.at[2, :HID].set(b1_f[0])
    b_slab = b_slab.at[3, :C].set(b2[0])

    x2d = x.reshape(B * T, C)                             # free layout reshape in XLA

    out2d = pl.pallas_call(
        block_kernel,
        out_shape=jax.ShapeDtypeStruct((B * T, C), f32),
        # Single invocation (no grid): 4 input streams, everything VMEM-resident.
        in_specs=[pl.BlockSpec(memory_space=pltpu.MemorySpace.VMEM)] * 4,
        out_specs=pl.BlockSpec(memory_space=pltpu.MemorySpace.VMEM),
    )(x2d, w_slab, wp_h, b_slab)

    return out2d.reshape(B, T, C)


# ------------------------ pure-JAX reference (check) ------------------------
def reference_block(x, params):
    (ln1w, ln1b, wq, bq, wk, bk, wv, bv, wp, bp,
     ln2w, ln2b, w1, b1, w2, b2) = params

    def ln(z, w, b):
        mu = jnp.mean(z, axis=-1, keepdims=True)
        var = jnp.mean((z - mu) ** 2, axis=-1, keepdims=True)
        return (z - mu) / jnp.sqrt(var + EPS) * w + b

    h = ln(x, ln1w, ln1b)
    q = h @ wq + bq
    k = h @ wk + bk
    v = h @ wv + bv
    q = q.reshape(B, T, N_HEAD, HEAD_DIM).transpose(0, 2, 1, 3)
    k = k.reshape(B, T, N_HEAD, HEAD_DIM).transpose(0, 2, 1, 3)
    v = v.reshape(B, T, N_HEAD, HEAD_DIM).transpose(0, 2, 1, 3)
    att = jnp.einsum("bhqd,bhkd->bhqk", q, k) / math.sqrt(HEAD_DIM)
    att = jax.nn.softmax(att, axis=-1)
    y = jnp.einsum("bhqk,bhkd->bhqd", att, v)
    y = y.transpose(0, 2, 1, 3).reshape(B, T, C)
    y = y @ wp + bp
    x = x + y
    h2 = ln(x, ln2w, ln2b)
    m = jnp.maximum(h2 @ w1 + b1, 0.0) @ w2 + b2
    return x + m


# --------------------------------- main --------------------------------------
if __name__ == "__main__":
    key = jax.random.PRNGKey(0)
    keys = jax.random.split(key, 20)

    def init(k, shape, scale=0.1):
        return (scale * jax.random.normal(k, shape)).astype(jnp.float32)

    # Deterministic synthetic parameters (shapes match the PyTorch module's
    # __init__; linear weights stored as (in, out) so y = x @ W + b).
    # Non-trivial LayerNorm affines so the trace-time folding is exercised.
    ln1w = (1.0 + 0.1 * jax.random.normal(keys[13], (1, C))).astype(jnp.float32)
    ln1b = init(keys[14], (1, C))
    ln2w = (1.0 + 0.1 * jax.random.normal(keys[15], (1, C))).astype(jnp.float32)
    ln2b = init(keys[16], (1, C))
    wq, bq = init(keys[0], (C, C)), init(keys[1], (1, C))
    wk, bk = init(keys[2], (C, C)), init(keys[3], (1, C))
    wv, bv = init(keys[4], (C, C)), init(keys[5], (1, C))
    wp, bp = init(keys[6], (C, C)), init(keys[7], (1, C))
    w1, b1 = init(keys[8], (C, HID)), init(keys[9], (1, HID))
    w2, b2 = init(keys[10], (HID, C)), init(keys[11], (1, C))

    params = (ln1w, ln1b, wq, bq, wk, bk, wv, bv, wp, bp,
              ln2w, ln2b, w1, b1, w2, b2)

    x = jax.random.normal(keys[12], (B, T, C), dtype=jnp.float32)

    out = transformer_block(x, params)
    out = jax.block_until_ready(out)

    ref = jax.block_until_ready(reference_block(x, params))
    assert out.shape == (B, T, C)
    # Tolerance covers bf16 MXU operands + approximate reciprocal vs f32 reference.
    assert jnp.max(jnp.abs(out - ref)) < 5e-2, "mismatch vs reference"

    print("KERNEL_OK")
</pallas_src>

<mosaic_0001>
module attributes {stable_mosaic.version = 11 : i64} {
  func.func @block_kernel(%arg0: memref<16x32xf32, #tpu.memory_space<vmem>>, %arg1: memref<192x128xbf16, #tpu.memory_space<vmem>>, %arg2: memref<4x8x32xbf16, #tpu.memory_space<vmem>>, %arg3: memref<8x128xf32, #tpu.memory_space<vmem>>, %arg4: memref<16x32xf32, #tpu.memory_space<vmem>>) attributes {dimension_semantics = [], scalar_prefetch = 0 : i64, scratch_operands = 0 : i64, tpu.core_type = #tpu.core_type<tc>} {
    %c0 = arith.constant 0 : index
    %c0_0 = arith.constant 0 : index
    %0 = vector.load %arg0[%c0, %c0_0] : memref<16x32xf32, #tpu.memory_space<vmem>>, vector<16x32xf32>
    %cst = arith.constant dense<0.000000e+00> : vector<16xf32>
    %1 = vector.multi_reduction <add>, %0, %cst [1] : vector<16x32xf32> to vector<16xf32>
    %2 = vector.shape_cast %1 : vector<16xf32> to vector<16x1xf32>
    %cst_1 = arith.constant 3.200000e+01 : f32
    %3 = vector.broadcast %cst_1 : f32 to vector<16x1xf32>
    %4 = arith.divf %2, %3 : vector<16x1xf32>
    %5 = vector.broadcast %4 : vector<16x1xf32> to vector<16x32xf32>
    %6 = arith.subf %0, %5 : vector<16x32xf32>
    %7 = arith.mulf %6, %6 : vector<16x32xf32>
    %cst_2 = arith.constant dense<0.000000e+00> : vector<16xf32>
    %8 = vector.multi_reduction <add>, %7, %cst_2 [1] : vector<16x32xf32> to vector<16xf32>
    %9 = vector.shape_cast %8 : vector<16xf32> to vector<16x1xf32>
    %cst_3 = arith.constant 3.200000e+01 : f32
    %10 = vector.broadcast %cst_3 : f32 to vector<16x1xf32>
    %11 = arith.divf %9, %10 : vector<16x1xf32>
    %12 = vector.broadcast %4 : vector<16x1xf32> to vector<16x32xf32>
    %13 = arith.subf %0, %12 : vector<16x32xf32>
    %cst_4 = arith.constant 9.99999997E-7 : f32
    %14 = vector.broadcast %cst_4 : f32 to vector<16x1xf32>
    %15 = arith.addf %11, %14 : vector<16x1xf32>
    %16 = math.rsqrt %15 : vector<16x1xf32>
    %17 = vector.broadcast %16 : vector<16x1xf32> to vector<16x32xf32>
    %18 = arith.mulf %13, %17 : vector<16x32xf32>
    %19 = arith.truncf %18 : vector<16x32xf32> to vector<16x32xbf16>
    %c0_5 = arith.constant 0 : index
    %c0_6 = arith.constant 0 : index
    %20 = vector.load %arg1[%c0_5, %c0_6] : memref<192x128xbf16, #tpu.memory_space<vmem>>, vector<32x128xbf16>
    %cst_7 = arith.constant dense<0.000000e+00> : vector<16x128xf32>
    %21 = tpu.matmul %19, %20, %cst_7 {dimension_numbers = #tpu.dot_dimension_numbers<[1], [0], [0], [1], [0, 0, 1, 1], [], []>} : vector<16x32xbf16>, vector<32x128xbf16>, vector<16x128xf32> -> vector<16x128xf32>
    %c0_8 = arith.constant 0 : index
    %c0_9 = arith.constant 0 : index
    %22 = vector.load %arg3[%c0_8, %c0_9] : memref<8x128xf32, #tpu.memory_space<vmem>>, vector<1x128xf32>
    %23 = vector.broadcast %22 : vector<1x128xf32> to vector<16x128xf32>
    %24 = arith.addf %21, %23 : vector<16x128xf32>
    %25 = vector.extract_strided_slice %24 {offsets = [0, 0], sizes = [16, 8], strides = [1, 1]} : vector<16x128xf32> to vector<16x8xf32>
    %26 = vector.shape_cast %25 : vector<16x8xf32> to vector<2x8x8xf32>
    %27 = vector.extract_strided_slice %24 {offsets = [0, 8], sizes = [16, 8], strides = [1, 1]} : vector<16x128xf32> to vector<16x8xf32>
    %28 = vector.shape_cast %27 : vector<16x8xf32> to vector<2x8x8xf32>
    %29 = vector.extract_strided_slice %24 {offsets = [0, 16], sizes = [16, 8], strides = [1, 1]} : vector<16x128xf32> to vector<16x8xf32>
    %30 = vector.shape_cast %29 : vector<16x8xf32> to vector<2x8x8xf32>
    %31 = vector.extract_strided_slice %24 {offsets = [0, 24], sizes = [16, 8], strides = [1, 1]} : vector<16x128xf32> to vector<16x8xf32>
    %32 = vector.shape_cast %31 : vector<16x8xf32> to vector<2x8x8xf32>
    %33 = tpu.concatenate %26, %28, %30, %32 in 0 : vector<2x8x8xf32>, vector<2x8x8xf32>, vector<2x8x8xf32>, vector<2x8x8xf32> -> vector<8x8x8xf32>
    %34 = arith.truncf %33 : vector<8x8x8xf32> to vector<8x8x8xbf16>
    %35 = vector.extract_strided_slice %24 {offsets = [0, 32], sizes = [16, 8], strides = [1, 1]} : vector<16x128xf32> to vector<16x8xf32>
    %36 = vector.shape_cast %35 : vector<16x8xf32> to vector<2x8x8xf32>
    %37 = vector.extract_strided_slice %24 {offsets = [0, 40], sizes = [16, 8], strides = [1, 1]} : vector<16x128xf32> to vector<16x8xf32>
    %38 = vector.shape_cast %37 : vector<16x8xf32> to vector<2x8x8xf32>
    %39 = vector.extract_strided_slice %24 {offsets = [0, 48], sizes = [16, 8], strides = [1, 1]} : vector<16x128xf32> to vector<16x8xf32>
    %40 = vector.shape_cast %39 : vector<16x8xf32> to vector<2x8x8xf32>
    %41 = vector.extract_strided_slice %24 {offsets = [0, 56], sizes = [16, 8], strides = [1, 1]} : vector<16x128xf32> to vector<16x8xf32>
    %42 = vector.shape_cast %41 : vector<16x8xf32> to vector<2x8x8xf32>
    %43 = tpu.concatenate %36, %38, %40, %42 in 0 : vector<2x8x8xf32>, vector<2x8x8xf32>, vector<2x8x8xf32>, vector<2x8x8xf32> -> vector<8x8x8xf32>
    %44 = arith.truncf %43 : vector<8x8x8xf32> to vector<8x8x8xbf16>
    %45 = vector.extract_strided_slice %24 {offsets = [0, 64], sizes = [16, 8], strides = [1, 1]} : vector<16x128xf32> to vector<16x8xf32>
    %46 = vector.shape_cast %45 : vector<16x8xf32> to vector<2x8x8xf32>
    %47 = vector.extract_strided_slice %24 {offsets = [0, 72], sizes = [16, 8], strides = [1, 1]} : vector<16x128xf32> to vector<16x8xf32>
    %48 = vector.shape_cast %47 : vector<16x8xf32> to vector<2x8x8xf32>
    %49 = vector.extract_strided_slice %24 {offsets = [0, 80], sizes = [16, 8], strides = [1, 1]} : vector<16x128xf32> to vector<16x8xf32>
    %50 = vector.shape_cast %49 : vector<16x8xf32> to vector<2x8x8xf32>
    %51 = vector.extract_strided_slice %24 {offsets = [0, 88], sizes = [16, 8], strides = [1, 1]} : vector<16x128xf32> to vector<16x8xf32>
    %52 = vector.shape_cast %51 : vector<16x8xf32> to vector<2x8x8xf32>
    %53 = tpu.concatenate %46, %48, %50, %52 in 0 : vector<2x8x8xf32>, vector<2x8x8xf32>, vector<2x8x8xf32>, vector<2x8x8xf32> -> vector<8x8x8xf32>
    %54 = arith.truncf %53 : vector<8x8x8xf32> to vector<8x8x8xbf16>
    "tpu.trace_start"() <{level = 10 : i32, message = "nqd,nkd->nqk"}> : () -> ()
    %cst_10 = arith.constant dense<0.000000e+00> : vector<8x8x8xf32>
    %55 = tpu.matmul %34, %44, %cst_10 {dimension_numbers = #tpu.dot_dimension_numbers<[2], [2], [1], [1], [0, 0, 0, 1, 1, 1], [0], [0]>} : vector<8x8x8xbf16>, vector<8x8x8xbf16>, vector<8x8x8xf32> -> vector<8x8x8xf32>
    "tpu.trace_stop"() : () -> ()
    %cst_11 = arith.constant dense<0xFF800000> : vector<8x8xf32>
    %56 = vector.multi_reduction <maximumf>, %55, %cst_11 [2] : vector<8x8x8xf32> to vector<8x8xf32>
    %57 = vector.shape_cast %56 : vector<8x8xf32> to vector<8x8x1xf32>
    %58 = vector.broadcast %57 : vector<8x8x1xf32> to vector<8x8x8xf32>
    %59 = arith.subf %55, %58 : vector<8x8x8xf32>
    %60 = math.exp %59 : vector<8x8x8xf32>
    %cst_12 = arith.constant dense<0.000000e+00> : vector<8x8xf32>
    %61 = vector.multi_reduction <add>, %60, %cst_12 [2] : vector<8x8x8xf32> to vector<8x8xf32>
    %62 = vector.shape_cast %61 : vector<8x8xf32> to vector<8x8x1xf32>
    %63 = tpu.reciprocal %62 {approx = true} : vector<8x8x1xf32> -> vector<8x8x1xf32>
    %64 = vector.broadcast %63 : vector<8x8x1xf32> to vector<8x8x8xf32>
    %65 = arith.mulf %60, %64 : vector<8x8x8xf32>
    %66 = arith.truncf %65 : vector<8x8x8xf32> to vector<8x8x8xbf16>
    "tpu.trace_start"() <{level = 10 : i32, message = "nqk,nkd->nqd"}> : () -> ()
    %cst_13 = arith.constant dense<0.000000e+00> : vector<8x8x8xf32>
    %67 = tpu.matmul %66, %54, %cst_13 {dimension_numbers = #tpu.dot_dimension_numbers<[2], [1], [1], [2], [0, 0, 0, 1, 1, 2], [0], [0]>} : vector<8x8x8xbf16>, vector<8x8x8xbf16>, vector<8x8x8xf32> -> vector<8x8x8xf32>
    "tpu.trace_stop"() : () -> ()
    %68 = vector.shape_cast %67 : vector<8x8x8xf32> to vector<4x16x8xf32>
    %69 = arith.truncf %68 : vector<4x16x8xf32> to vector<4x16x8xbf16>
    %c0_14 = arith.constant 0 : index
    %c0_15 = arith.constant 0 : index
    %c0_16 = arith.constant 0 : index
    %70 = vector.load %arg2[%c0_14, %c0_15, %c0_16] : memref<4x8x32xbf16, #tpu.memory_space<vmem>>, vector<4x8x32xbf16>
    "tpu.trace_start"() <{level = 10 : i32, message = "hnd,hdc->hnc"}> : () -> ()
    %cst_17 = arith.constant dense<0.000000e+00> : vector<4x16x32xf32>
    %71 = tpu.matmul %69, %70, %cst_17 {dimension_numbers = #tpu.dot_dimension_numbers<[2], [1], [1], [2], [0, 0, 0, 1, 1, 2], [0], [0]>} : vector<4x16x8xbf16>, vector<4x8x32xbf16>, vector<4x16x32xf32> -> vector<4x16x32xf32>
    "tpu.trace_stop"() : () -> ()
    %cst_18 = arith.constant dense<0.000000e+00> : vector<16x32xf32>
    %72 = vector.multi_reduction <add>, %71, %cst_18 [0] : vector<4x16x32xf32> to vector<16x32xf32>
    %c1 = arith.constant 1 : index
    %c0_19 = arith.constant 0 : index
    %73 = vector.load %arg3[%c1, %c0_19] : memref<8x128xf32, #tpu.memory_space<vmem>>, vector<1x32xf32>
    %74 = vector.broadcast %73 : vector<1x32xf32> to vector<16x32xf32>
    %75 = arith.addf %72, %74 : vector<16x32xf32>
    %76 = arith.addf %0, %75 : vector<16x32xf32>
    %cst_20 = arith.constant dense<0.000000e+00> : vector<16xf32>
    %77 = vector.multi_reduction <add>, %76, %cst_20 [1] : vector<16x32xf32> to vector<16xf32>
    %78 = vector.shape_cast %77 : vector<16xf32> to vector<16x1xf32>
    %cst_21 = arith.constant 3.200000e+01 : f32
    %79 = vector.broadcast %cst_21 : f32 to vector<16x1xf32>
    %80 = arith.divf %78, %79 : vector<16x1xf32>
    %81 = vector.broadcast %80 : vector<16x1xf32> to vector<16x32xf32>
    %82 = arith.subf %76, %81 : vector<16x32xf32>
    %83 = arith.mulf %82, %82 : vector<16x32xf32>
    %cst_22 = arith.constant dense<0.000000e+00> : vector<16xf32>
    %84 = vector.multi_reduction <add>, %83, %cst_22 [1] : vector<16x32xf32> to vector<16xf32>
    %85 = vector.shape_cast %84 : vector<16xf32> to vector<16x1xf32>
    %cst_23 = arith.constant 3.200000e+01 : f32
    %86 = vector.broadcast %cst_23 : f32 to vector<16x1xf32>
    %87 = arith.divf %85, %86 : vector<16x1xf32>
    %88 = vector.broadcast %80 : vector<16x1xf32> to vector<16x32xf32>
    %89 = arith.subf %76, %88 : vector<16x32xf32>
    %cst_24 = arith.constant 9.99999997E-7 : f32
    %90 = vector.broadcast %cst_24 : f32 to vector<16x1xf32>
    %91 = arith.addf %87, %90 : vector<16x1xf32>
    %92 = math.rsqrt %91 : vector<16x1xf32>
    %93 = vector.broadcast %92 : vector<16x1xf32> to vector<16x32xf32>
    %94 = arith.mulf %89, %93 : vector<16x32xf32>
    %95 = arith.truncf %94 : vector<16x32xf32> to vector<16x32xbf16>
    %c32 = arith.constant 32 : index
    %c0_25 = arith.constant 0 : index
    %96 = vector.load %arg1[%c32, %c0_25] : memref<192x128xbf16, #tpu.memory_space<vmem>>, vector<32x128xbf16>
    %cst_26 = arith.constant dense<0.000000e+00> : vector<16x128xf32>
    %97 = tpu.matmul %95, %96, %cst_26 {dimension_numbers = #tpu.dot_dimension_numbers<[1], [0], [0], [1], [0, 0, 1, 1], [], []>} : vector<16x32xbf16>, vector<32x128xbf16>, vector<16x128xf32> -> vector<16x128xf32>
    %c2 = arith.constant 2 : index
    %c0_27 = arith.constant 0 : index
    %98 = vector.load %arg3[%c2, %c0_27] : memref<8x128xf32, #tpu.memory_space<vmem>>, vector<1x128xf32>
    %99 = vector.broadcast %98 : vector<1x128xf32> to vector<16x128xf32>
    %100 = arith.addf %97, %99 : vector<16x128xf32>
    %cst_28 = arith.constant 0.000000e+00 : f32
    %101 = vector.broadcast %cst_28 : f32 to vector<16x128xf32>
    %102 = arith.maximumf %100, %101 : vector<16x128xf32>
    %103 = arith.truncf %102 : vector<16x128xf32> to vector<16x128xbf16>
    %c64 = arith.constant 64 : index
    %c0_29 = arith.constant 0 : index
    %104 = vector.load %arg1[%c64, %c0_29] : memref<192x128xbf16, #tpu.memory_space<vmem>>, vector<128x32xbf16>
    %cst_30 = arith.constant dense<0.000000e+00> : vector<16x32xf32>
    %105 = tpu.matmul %103, %104, %cst_30 {dimension_numbers = #tpu.dot_dimension_numbers<[1], [0], [0], [1], [0, 0, 1, 1], [], []>} : vector<16x128xbf16>, vector<128x32xbf16>, vector<16x32xf32> -> vector<16x32xf32>
    %c3 = arith.constant 3 : index
    %c0_31 = arith.constant 0 : index
    %106 = vector.load %arg3[%c3, %c0_31] : memref<8x128xf32, #tpu.memory_space<vmem>>, vector<1x32xf32>
    %107 = vector.broadcast %106 : vector<1x32xf32> to vector<16x32xf32>
    %108 = arith.addf %105, %107 : vector<16x32xf32>
    %109 = arith.addf %76, %108 : vector<16x32xf32>
    %c0_32 = arith.constant 0 : index
    %c0_33 = arith.constant 0 : index
    %110 = vector.load %arg4[%c0_32, %c0_33] : memref<16x32xf32, #tpu.memory_space<vmem>>, vector<16x32xf32>
    tpu.vector_store %arg4[%c0_32, %c0_33], %109 {strides = array<i32>} : memref<16x32xf32, #tpu.memory_space<vmem>>, vector<16x32xf32>,
    return
  }
}

</mosaic_0001>

<bundles_post_ra>
// kernel: tpu_custom_call.1
= control target key start
LH: loop header
LB: loop body
LE: loop exit
PB: predicated region body
PF: predicated region fallthrough
CT: control target
= control target key end

     0   :  { %9 = vsyncpa [#allocation3], 0  ;;  %s2276_s0 = inlined_call_operand.hbm [shape: f32[16,32], index: 0, kind: input, shape index: {}]   ;;  %s2277_s1 = inlined_call_operand.hbm [shape: bf16[192,128], index: 1, kind: input, shape index: {}]   ;;  %s2278_s2 = inlined_call_operand.hbm [shape: bf16[4,8,32], index: 2, kind: input, shape index: {}]   ;;  %s2279_s3 = inlined_call_operand.hbm [shape: f32[8,128], index: 3, kind: input, shape index: {}]   ;;  %s2280_s4 = inlined_call_operand.hbm [shape: f32[16,32], index: 4, kind: output, shape index: {}]  }
   0x1   :  { %10 = vsyncpa [#allocation6], 0 }
   0x2   :  { %11 = vsyncpa [#allocation9], 0 }
   0x3   :  { %12 = vsyncpa [#allocation4], 0  ;;  %s1956_s15 = smov [#allocation5]  }
   0x4   :  { %s30_s16 = sshll.u32 %s1956_s15, 4  ;;  %s31_s16 = int_to_ptr.vmem [resolvable:$true] %s30_s16 }
   0x5   :  { %s1856_s17 = scalar_lea.vmem %s31_s16, 1536  ;;  %p1861_p1 = scmp.lt.s32.totalorder %s31_s16, %s31_s16 }
   0x6   :  { %p1857_p0 = scmp.ne.s32.totalorder %s31_s16, %s1856_s17  ;;  %p1862_p2 = scmp.lt.s32.totalorder %s1856_s17, %s1856_s17 }
   0x8   :  { %p1863_p3 = por %p1862_p2, %p1861_p1 }
   0xa   :  { %p1864_p4 = pnand %p1863_p3, %p1857_p0 }
   0xc   :  { %1867 = shalt.err (!%p1864_p4)
}
   0xd   :  { %s1957_s18 = smov 64   ;;  %s1958_s19 = smov 4  }
   0xe   :  { %36 = dma.hbm_to_vmem [thread:$0]  %s2277_s1, 1536, %s31_s16, [#allocation6], %s1957_s18, %s1957_s18, %s1958_s19  }
   0xf   :  { %s1959_s22 = smov [#allocation2]  }
  0x10   :  { %s18_s23 = sshll.u32 %s1959_s22, 4  ;;  %s19_s23 = int_to_ptr.vmem [resolvable:$true] %s18_s23 }
  0x11   :  { %s1876_s24 = scalar_lea.vmem %s19_s23, 256  ;;  %p1881_p6 = scmp.lt.s32.totalorder %s19_s23, %s19_s23 }
  0x12   :  { %p1877_p5 = scmp.ne.s32.totalorder %s19_s23, %s1876_s24  ;;  %p1882_p7 = scmp.lt.s32.totalorder %s1876_s24, %s1876_s24 }
  0x14   :  { %p1883_p8 = por %p1882_p7, %p1881_p6 }
  0x16   :  { %p1884_p9 = pnand %p1883_p8, %p1877_p5 }
  0x18   :  { %1887 = shalt.err (!%p1884_p9)
}
  0x19   :  { %s1960_s25 = smov 128   ;;  %s1961_s26 = smov 8  }
  0x1a   :  { %24 = dma.hbm_to_vmem [thread:$0]  %s2276_s0, 256, %s19_s23, [#allocation3], %s1960_s25, %s1960_s25, %s1961_s26  }
  0x1b   :  { %s1962_s1 = smov [#allocation7]   ;;  %s1963_s30 = smov [#allocation8]  }
  0x1c   :  { %s42_s29 = sshll.u32 %s1962_s1, 4  ;;  %s55_s5 = sshll.u32 %s1963_s30, 4  ;;  %s43_s29 = int_to_ptr.vmem [resolvable:$true] %s42_s29  ;;  %s56_s5 = int_to_ptr.vmem [resolvable:$true] %s55_s5 }
  0x1d   :  { %s1896_s6 = scalar_lea.vmem %s43_s29, 256  ;;  %p1901_p11 = scmp.lt.s32.totalorder %s43_s29, %s43_s29 }
  0x1e   :  { %p1897_p10 = scmp.ne.s32.totalorder %s43_s29, %s1896_s6  ;;  %p1902_p12 = scmp.lt.s32.totalorder %s1896_s6, %s1896_s6 }
  0x20   :  { %p1903_p13 = por %p1902_p12, %p1901_p11 }
  0x22   :  { %p1904_p0 = pnand %p1903_p13, %p1897_p10 }
  0x24   :  { %1907 = shalt.err (!%p1904_p0)
}
  0x25   :  { %48 = dma.hbm_to_vmem [thread:$0]  %s2278_s2, 256, %s43_s29, [#allocation6], %s1957_s18, %s1957_s18, %s1958_s19  }
  0x26   :  { %s1916_s0 = scalar_lea.vmem %s56_s5, 128  ;;  %p1921_p2 = scmp.lt.s32.totalorder %s56_s5, %s56_s5 }
  0x27   :  { %p1917_p1 = scmp.ne.s32.totalorder %s56_s5, %s1916_s0  ;;  %p1922_p3 = scmp.lt.s32.totalorder %s1916_s0, %s1916_s0 }
  0x29   :  { %p1923_p4 = por %p1922_p3, %p1921_p2 }
  0x2b   :  { %p1924_p5 = pnand %p1923_p4, %p1917_p1 }
  0x2d   :  { %1927 = shalt.err (!%p1924_p5)
}
  0x2e   :  { %58 = dma.hbm_to_vmem [thread:$0]  %s2279_s3, 128, %s56_s5, [#allocation9]  }
  0x2f   :  { %1948 = dma.done.wait [#allocation3], 256  }
  0x30   :  { %1949 = vsyncadd [#allocation3], 4294967040 }
  0x31   :  { %1950 = dma.done.wait [#allocation6], 1792  }
  0x32   :  { %1951 = vsyncadd [#allocation6], 4294965504 }
  0x33   :  { %1952 = dma.done.wait [#allocation9], 128  }
  0x34   :  { %1953 = vsyncadd [#allocation9], 4294967168  ;;  %vm74_vm0 = vcmask 261120   ;;  %v2017_v0 = vld [vmem:[#allocation2] sm:$0xff]  ;;  %v2019_v1 = vld [vmem:[#allocation2 + $0x8] sm:$0xff]  ;;  %v1964_v15 = vmov 0.0  }
  0x35   :  { %v75_v2 = vsel %vm74_vm0, %v2017_v0, 0.0  ;;  %v78_v3 = vsel %vm74_vm0, %v2019_v1, 0.0  ;;  %v1796_v14 = vld [vmem:[#allocation5 + $0x8] sm:$0xff]   ;;  %1610 = vmatprep.subr.bf16.mxu1 %v1964_v15  ;;  %vm1965_vm1 = vmmov 0   ;;  %v1797_v16 = vld [vmem:[#allocation5] sm:$0xff]   ;;  %1636 = vmatprep.subr.bf16.mxu0 %v1964_v15  ;;  %s1966_s2 = smov 112  }
  0x36   :  { %76 = vadd.xlane.f32.xlu0 %v75_v2  ;;  %1614 = vmatprep.mubr.msk.bf16.mxu1 %vm1965_vm1, %v1964_v15  ;;  %v1517_v29 = vld [vmem:[#allocation8] ss:$0 sm:$0xff]  ;;  %s1967_s3 = smov 120   ;;  %s1968_s11 = smov 104   ;;  %vm199_vm2 = vcmask 64512   ;;  %vm690_vm3 = vcmask 1043456  }
  0x37   :  { %1611 = vmatpush3.bf16.msra.mxu1 %v1796_v14  ;;  %1638 = vmatprep.mubr.msk.bf16.mxu0 %vm1965_vm1, %v1964_v15  ;;  %s1969_s12 = smov 96   ;;  %s1970_s13 = smov [#allocation10]  }
  0x38   :  { %1612 = vmatprep.subr.bf16.mxu1 %v1964_v15  ;;  %s1503_s14 = sshll.u32 %s1970_s13, 4  ;;  %s1504_s14 = int_to_ptr.vmem [resolvable:$true] %s1503_s14 }
  0x39   :  { %s1928_s15 = scalar_lea.vmem %s1504_s14, 256  ;;  %p1933_p7 = scmp.lt.s32.totalorder %s1504_s14, %s1504_s14 }
  0x3a   :  { %79 = vadd.xlane.f32.xlu0 %v78_v3  ;;  %p1929_p6 = scmp.ne.s32.totalorder %s1504_s14, %s1928_s15  ;;  %p1934_p8 = scmp.lt.s32.totalorder %s1928_s15, %s1928_s15 }
  0x3b   :  { %1613 = vmatpush3.bf16.msra.mxu1 %v1797_v16 }
  0x3c   :  { %1618 = vmatprep.subr.bf16.mxu1 %v1964_v15  ;;  %p1935_p9 = por %p1934_p8, %p1933_p7 }
  0x3e   :  { %p1936_p10 = pnand %p1935_p9, %p1929_p6 }
  0xbf   :  { %v77_v4 = vpop.xlane.xlu0 %76 }
  0xc0   :  { %v82_v5 = vmul.f32 0.03125, %v77_v4 }
  0xc2   :  { %v84_v6 = vsub.f32 %v2017_v0, %v82_v5 }
  0xc3   :  { %v80_v7 = vpop.xlane.xlu0 %79 }
  0xc4   :  { %v83_v8 = vmul.f32 0.03125, %v80_v7  ;;  %v86_v9 = vmul.f32 %v84_v6, %v84_v6 }
  0xc6   :  { %v85_v10 = vsub.f32 %v2019_v1, %v83_v8  ;;  %v88_v11 = vsel %vm74_vm0, %v86_v9, 0.0 }
  0xc7   :  { %89 = vadd.xlane.f32.xlu1 %v88_v11 }
  0xc8   :  { %v87_v12 = vmul.f32 %v85_v10, %v85_v10 }
  0xca   :  { %v91_v13 = vsel %vm74_vm0, %v87_v12, 0.0 }
  0xcb   :  { %92 = vadd.xlane.f32.xlu1 %v91_v13 }
 0x150   :  { %v90_v17 = vpop.xlane.xlu1 %89 }
 0x151   :  { %v94_v18 = vmul.f32 0.03125, %v90_v17 }
 0x153   :  { %v96_v19 = vadd.f32 1e-06, %v94_v18 }
 0x154   :  { %v93_v20 = vpop.xlane.xlu1 %92 }
 0x155   :  { %v95_v21 = vmul.f32 0.03125, %v93_v20  ;;  %1808 = vrsqrt.f32 %v96_v19 }
 0x157   :  { %v97_v22 = vadd.f32 1e-06, %v95_v21 }
 0x159   :  { %1810 = vrsqrt.f32 %v97_v22 }
 0x162   :  { %v1809_v23 = vpop.eup %1808 }
 0x163   :  { %v100_v25 = vmul.f32 %v1809_v23, %v84_v6 }
 0x166   :  { %v1811_v24 = vpop.eup %1810 }
 0x167   :  { %v101_v26 = vmul.f32 %v1811_v24, %v85_v10 }
 0x169   :  { %v102_v27 = vpack.c.bf16 %v101_v26, %v100_v25 }
 0x16b   :  { %1615 = vmatmul.mubr.msk.bf16.vlgmr.msra.gmra.mxu1 %vm74_vm0, %v102_v27 }
 0x16c   :  { %1620 = vmatprep.mubr.msk.bf16.mxu1 %vm1965_vm1, %v1964_v15 }
 0x22b   :  { %v161_v28 = vpop.f32.mrf.mxu1 }
 0x22c   :  { %v162_v32 = vadd.f32 %v1517_v29, %v161_v28 }
 0x22d   :  { %v1616_v30 = vpop.f32.mrf.mxu1 }
 0x22e   :  { %v188_v37 = vpack.c.bf16 %v162_v32, %v162_v32 }
 0x22f   :  { %v164_v31 = vpop.f32.mrf.mxu1 }
 0x230   :  { %v165_v33 = vadd.f32 %v1517_v29, %v164_v31 }
 0x231   :  { %v1617_v34 = vpop.f32.mrf.mxu1 }
 0x232   :  { %v1786_v35 = vpack.i.bf16 %v165_v33, %v162_v32  ;;  %v2040_v36 = vpack.c.bf16 %v165_v33, %v165_v33 }
 0x234   :  { %1787 = vrot.lane.b32.xlu1 %v1786_v35, %s1966_s2  ;;  %1782 = vrot.lane.b32.xlu0 %v1786_v35, %s1967_s3 }
 0x238   :  { %1792 = vrot.lane.b32.xlu1 %v1786_v35, %s1968_s11  ;;  %247 = vrot.lane.b32.xlu0 %v2040_v36, %s1969_s12 }
 0x23c   :  { %197 = vrot.lane.b32.xlu1 %v188_v37, %s1969_s12 }
 0x2a6   :  { %v1788_v38 = vpop.permute.xlu1 %1787  ;;  %v1783_v39 = vpop.permute.xlu0 %1782 }
 0x2a7   :  { %v1785_v40 = vunpack.i.h.bf16 %v1783_v39  ;;  %v1784_v41 = vunpack.i.l.bf16 %v1783_v39  ;;  %v1790_v42 = vunpack.i.h.bf16 %v1788_v38  ;;  %v1789_v43 = vunpack.i.l.bf16 %v1788_v38 }
 0x2a9   :  { %v2043_v44 = vpack.c.bf16 %v1785_v40, %v1785_v40  ;;  %v2045_v45 = vpack.c.bf16 %v1784_v41, %v1784_v41  ;;  %v2049_v47 = vpack.c.bf16 %v1790_v42, %v1790_v42  ;;  %v2051_v48 = vpack.c.bf16 %v1789_v43, %v1789_v43 }
 0x2aa   :  { %v1793_v46 = vpop.permute.xlu1 %1792  ;;  %v248_v55 = vpop.permute.xlu0 %247 }
 0x2ab   :  { %296 = vrot.lane.b32.xlu1 %v2045_v45, %s1969_s12  ;;  %345 = vrot.lane.b32.xlu0 %v2043_v44, %s1969_s12  ;;  %v1795_v49 = vunpack.i.h.bf16 %v1793_v46  ;;  %v1794_v50 = vunpack.i.l.bf16 %v1793_v46  ;;  %v253_v56 = vsel %vm199_vm2, %v248_v55, 0 }
 0x2ad   :  { %v2056_v53 = vpack.c.bf16 %v1795_v49, %v1795_v49  ;;  %v2058_v54 = vpack.c.bf16 %v1794_v50, %v1794_v50 }
 0x2ae   :  { %v198_v51 = vpop.permute.xlu1 %197 }
 0x2af   :  { %v204_v52 = vsel %vm199_vm2, %v198_v51, 0  ;;  %394 = vrot.lane.b32.xlu1 %v2051_v48, %s1969_s12  ;;  %443 = vrot.lane.b32.xlu0 %v2049_v47, %s1969_s12 }
 0x2b0   :  { %1619 = vmatpush3.bf16.xpose.msra.mxu1 %v204_v52 }
 0x2b1   :  { %1624 = vmatprep.subr.bf16.mxu1 %v1964_v15 }
 0x2b3   :  { %492 = vrot.lane.b32.xlu1 %v2058_v54, %s1969_s12  ;;  %541 = vrot.lane.b32.xlu0 %v2056_v53, %s1969_s12 }
 0x2b7   :  { %1621 = vmatmul.mubr.msk.bf16.vlgmr.msra.gmra.mxu1 %vm199_vm2, %v188_v37  ;;  %685 = vrot.lane.b32.xlu1 %v188_v37, %s1957_s18 }
 0x2b8   :  { %1625 = vmatpush3.bf16.xpose.msra.mxu1 %v253_v56  ;;  %1626 = vmatprep.mubr.msk.bf16.mxu1 %vm1965_vm1, %v1964_v15 }
 0x2b9   :  { %1630 = vmatprep.subr.bf16.mxu1 %v1964_v15 }
 0x2bf   :  { %1627 = vmatmul.mubr.msk.bf16.vlgmr.msra.gmra.mxu1 %vm199_vm2, %v2040_v36 }
 0x2c0   :  { %1632 = vmatprep.mubr.msk.bf16.mxu1 %vm1965_vm1, %v1964_v15 }
 0x31d   :  { %v297_v57 = vpop.permute.xlu1 %296  ;;  %v346_v58 = vpop.permute.xlu0 %345 }
 0x31e   :  { %v302_v59 = vsel %vm199_vm2, %v297_v57, 0  ;;  %v351_v60 = vsel %vm199_vm2, %v346_v58, 0 }
 0x31f   :  { %1631 = vmatpush3.bf16.xpose.msra.mxu1 %v302_v59  ;;  %1637 = vmatpush3.bf16.xpose.msra.mxu0 %v351_v60 }
 0x320   :  { %1642 = vmatprep.subr.bf16.mxu1 %v1964_v15  ;;  %1648 = vmatprep.subr.bf16.mxu0 %v1964_v15 }
 0x321   :  { %v395_v61 = vpop.permute.xlu1 %394  ;;  %v444_v62 = vpop.permute.xlu0 %443 }
 0x322   :  { %v400_v63 = vsel %vm199_vm2, %v395_v61, 0  ;;  %v449_v2 = vsel %vm199_vm2, %v444_v62, 0 }
 0x325   :  { %v493_v3 = vpop.permute.xlu1 %492  ;;  %v542_v4 = vpop.permute.xlu0 %541 }
 0x326   :  { %1633 = vmatmul.mubr.msk.bf16.vlgmr.msra.gmra.mxu1 %vm199_vm2, %v2045_v45  ;;  %1639 = vmatmul.mubr.msk.bf16.vlgmr.msra.gmra.mxu0 %vm199_vm2, %v2043_v44  ;;  %v498_v5 = vsel %vm199_vm2, %v493_v3, 0  ;;  %v547_v6 = vsel %vm199_vm2, %v542_v4, 0 }
 0x327   :  { %1643 = vmatpush3.bf16.xpose.msra.mxu1 %v400_v63  ;;  %1649 = vmatpush3.bf16.xpose.msra.mxu0 %v449_v2 }
 0x328   :  { %1644 = vmatprep.mubr.msk.bf16.mxu1 %vm1965_vm1, %v1964_v15  ;;  %1650 = vmatprep.mubr.msk.bf16.mxu0 %vm1965_vm1, %v1964_v15 }
 0x329   :  { %1654 = vmatprep.subr.bf16.mxu1 %v1964_v15  ;;  %1660 = vmatprep.subr.bf16.mxu0 %v1964_v15  ;;  %v686_v7 = vpop.permute.xlu1 %685 }
 0x32a   :  { %v692_v8 = vsel %vm690_vm3, %v686_v7, 0 }
 0x32e   :  { %1645 = vmatmul.mubr.msk.bf16.vlgmr.msra.gmra.mxu1 %vm199_vm2, %v2051_v48  ;;  %1651 = vmatmul.mubr.msk.bf16.vlgmr.msra.gmra.mxu0 %vm199_vm2, %v2049_v47 }
 0x32f   :  { %1655 = vmatpush3.bf16.xpose.msra.mxu1 %v498_v5  ;;  %1661 = vmatpush3.bf16.xpose.msra.mxu0 %v547_v6 }
 0x330   :  { %1656 = vmatprep.mubr.msk.bf16.mxu1 %vm1965_vm1, %v1964_v15  ;;  %1662 = vmatprep.mubr.msk.bf16.mxu0 %vm1965_vm1, %v1964_v15 }
 0x331   :  { %1666 = vmatprep.subr.bf16.mxu1 %v1964_v15  ;;  %1672 = vmatprep.subr.bf16.mxu0 %v1964_v15 }
 0x336   :  { %1657 = vmatmul.mubr.msk.bf16.vlgmr.msra.gmra.mxu1 %vm199_vm2, %v2058_v54  ;;  %1663 = vmatmul.mubr.msk.bf16.vlgmr.msra.gmra.mxu0 %vm199_vm2, %v2056_v53 }
 0x337   :  { %1667 = vmatpush3.bf16.msra.mxu1 %v692_v8  ;;  %1674 = vmatprep.mubr.msk.bf16.mxu0 %vm1965_vm1, %v1964_v15 }
 0x338   :  { %1668 = vmatprep.mubr.msk.bf16.mxu1 %vm1965_vm1, %v1964_v15  ;;  %1678 = vmatprep.subr.bf16.mxu1 %v1964_v15 }
 0x377   :  { %v240_v9 = vpop.f32.mrf.mxu1 }
 0x378   :  { %v589_v10 = vsel %vm199_vm2, %v240_v9, -inf }
 0x379   :  { %590 = vmax.xlane.f32.xlu1 %v589_v10  ;;  %v1622_v11 = vpop.f32.mrf.mxu1 }
 0x37b   :  { %v243_v12 = vpop.f32.mrf.mxu1 }
 0x37d   :  { %v1623_v13 = vpop.f32.mrf.mxu1 }
 0x37f   :  { %v289_v14 = vpop.f32.mrf.mxu1 }
 0x380   :  { %v592_v16 = vsel %vm199_vm2, %v289_v14, -inf }
 0x381   :  { %593 = vmax.xlane.f32.xlu0 %v592_v16  ;;  %v1628_v17 = vpop.f32.mrf.mxu1 }
 0x383   :  { %v292_v18 = vpop.f32.mrf.mxu1 }
 0x385   :  { %v1629_v19 = vpop.f32.mrf.mxu1 }
 0x3e6   :  { %v338_v20 = vpop.f32.mrf.mxu1  ;;  %v387_v21 = vpop.f32.mrf.mxu0 }
 0x3e7   :  { %v595_v22 = vsel %vm199_vm2, %v338_v20, -inf  ;;  %v598_v27 = vsel %vm199_vm2, %v387_v21, -inf }
 0x3e8   :  { %v1640_v23 = vpop.f32.mrf.mxu0  ;;  %596 = vmax.xlane.f32.xlu0 %v595_v22  ;;  %v1634_v24 = vpop.f32.mrf.mxu1 }
 0x3ea   :  { %v341_v25 = vpop.f32.mrf.mxu1  ;;  %v390_v26 = vpop.f32.mrf.mxu0 }
 0x3ec   :  { %v1641_v28 = vpop.f32.mrf.mxu0  ;;  %599 = vmax.xlane.f32.xlu0 %v598_v27  ;;  %v1635_v29 = vpop.f32.mrf.mxu1 }
 0x3ee   :  { %v436_v30 = vpop.f32.mrf.mxu1  ;;  %v2115_v31 = vpop.f32.mrf.mxu0 }
 0x3ef   :  { %v604_v32 = vsel %vm199_vm2, %v2115_v31, -inf  ;;  %v601_v33 = vsel %vm199_vm2, %v436_v30, -inf }
 0x3f0   :  { %v1652_v34 = vpop.f32.mrf.mxu0  ;;  %605 = vmax.xlane.f32.xlu0 %v604_v32  ;;  %602 = vmax.xlane.f32.xlu1 %v601_v33  ;;  %v1646_v35 = vpop.f32.mrf.mxu1 }
 0x3f2   :  { %v439_v37 = vpop.f32.mrf.mxu1  ;;  %v488_v38 = vpop.f32.mrf.mxu0 }
 0x3f4   :  { %v1647_v39 = vpop.f32.mrf.mxu1  ;;  %v1653_v40 = vpop.f32.mrf.mxu0 }
 0x3f6   :  { %v534_v41 = vpop.f32.mrf.mxu1  ;;  %v2120_v42 = vpop.f32.mrf.mxu0 }
 0x3f7   :  { %v610_v43 = vsel %vm199_vm2, %v2120_v42, -inf  ;;  %v607_v46 = vsel %vm199_vm2, %v534_v41, -inf }
 0x3f8   :  { %v1664_v49 = vpop.f32.mrf.mxu0  ;;  %611 = vmax.xlane.f32.xlu0 %v610_v43  ;;  %608 = vmax.xlane.f32.xlu1 %v607_v46  ;;  %v1658_v50 = vpop.f32.mrf.mxu1 }
 0x3fa   :  { %v537_v51 = vpop.f32.mrf.mxu1  ;;  %v586_v52 = vpop.f32.mrf.mxu0 }
 0x3fc   :  { %v1659_v55 = vpop.f32.mrf.mxu1  ;;  %v1665_v56 = vpop.f32.mrf.mxu0 }
 0x402   :  { %v591_v59 = vpop.xlane.xlu1 %590 }
 0x403   :  { %v613_v60 = vsub.f32 %v240_v9, %v591_v59 }
 0x405   :  { %v621_v62 = vmul.f32 1.442695, %v613_v60 }
 0x409   :  { %782 = vrot.lane.b32.xlu1 %v2045_v45, %s1957_s18 }
 0x40a   :  { %v594_v57 = vpop.xlane.xlu0 %593 }
 0x40b   :  { %v614_v58 = vsub.f32 %v289_v14, %v594_v57 }
 0x40d   :  { %830 = vrot.lane.b32.xlu1 %v2043_v44, %s1957_s18  ;;  %v623_v61 = vmul.f32 1.442695, %v614_v58 }
 0x40e   :  { %734 = vrot.lane.b32.xlu0 %v2040_v36, %s1957_s18 }
 0x40f   :  { %1812 = vpow2.f32 %v623_v61 }
 0x410   :  { %1814 = vpow2.f32 %v621_v62 }
 0x41c   :  { %v1813_v63 = vpop.eup %1812 }
 0x41d   :  { %v640_v2 = vsel %vm199_vm2, %v1813_v63, 0.0  ;;  %v2132_v3 = vpop.eup %1814 }
 0x41e   :  { %v637_v44 = vsel %vm199_vm2, %v2132_v3, 0.0 }
 0x42d   :  { %641 = vadd.xlane.f32.xlu0 %v640_v2 }
 0x431   :  { %638 = vadd.xlane.f32.xlu1 %v637_v44 }
 0x442   :  { %878 = vrot.lane.b32.xlu1 %v2051_v48, %s1957_s18 }
 0x471   :  { %v597_v36 = vpop.xlane.xlu0 %596 }
 0x472   :  { %v615_v45 = vsub.f32 %v338_v20, %v597_v36 }
 0x474   :  { %v625_v4 = vmul.f32 1.442695, %v615_v45 }
 0x475   :  { %v600_v5 = vpop.xlane.xlu0 %599 }
 0x476   :  { %1816 = vpow2.f32 %v625_v4  ;;  %v616_v6 = vsub.f32 %v387_v21, %v600_v5  ;;  %v1074_v5 = vld [vmem:[#allocation7] sm:$0xf] }
 0x478   :  { %v627_v7 = vmul.f32 1.442695, %v616_v6 }
 0x479   :  { %v603_v8 = vpop.xlane.xlu1 %602  ;;  %v606_v11 = vpop.xlane.xlu0 %605 }
 0x47a   :  { %1818 = vpow2.f32 %v627_v7  ;;  %v617_v9 = vsub.f32 %v436_v30, %v603_v8  ;;  %v618_v26 = vsub.f32 %v2115_v31, %v606_v11  ;;  %v1082_v8 = vsel %vm690_vm3, %v1074_v5, 0 }
 0x47c   :  { %v629_v10 = vmul.f32 1.442695, %v617_v9  ;;  %v631_v27 = vmul.f32 1.442695, %v618_v26 }
 0x47e   :  { %1820 = vpow2.f32 %v629_v10 }
 0x481   :  { %v612_v12 = vpop.xlane.xlu0 %611  ;;  %v609_v13 = vpop.xlane.xlu1 %608 }
 0x482   :  { %v619_v14 = vsub.f32 %v534_v41, %v609_v13  ;;  %v620_v28 = vsub.f32 %v2120_v42, %v612_v12 }
 0x483   :  { %v2138_v16 = vpop.eup %1816 }
 0x484   :  { %v633_v17 = vmul.f32 1.442695, %v619_v14  ;;  %v643_v48 = vsel %vm199_vm2, %v2138_v16, 0.0  ;;  %v635_v29 = vmul.f32 1.442695, %v620_v28 }
 0x485   :  { %v735_v18 = vpop.permute.xlu0 %734  ;;  %644 = vadd.xlane.f32.xlu1 %v643_v48  ;;  %v783_v30 = vpop.permute.xlu1 %782 }
 0x486   :  { %v740_v19 = vsel %vm690_vm3, %v735_v18, 0  ;;  %1822 = vpow2.f32 %v633_v17  ;;  %v788_v46 = vsel %vm690_vm3, %v783_v30, 0  ;;  %v1076_v30 = vld [vmem:[#allocation7 + $0x8] sm:$0xf] }
 0x487   :  { %v2143_v20 = vpop.eup %1818  ;;  %1673 = vmatpush3.bf16.msra.mxu0 %v740_v19  ;;  %1824 = vpow2.f32 %v631_v27  ;;  %v1075_v19 = vld [vmem:[#allocation7 + $0x4] sm:$0xf] }
 0x488   :  { %v646_v21 = vsel %vm199_vm2, %v2143_v20, 0.0  ;;  %1684 = vmatprep.subr.bf16.mxu0 %v1964_v15  ;;  %1826 = vpow2.f32 %v635_v29 }
 0x489   :  { %647 = vadd.xlane.f32.xlu0 %v646_v21  ;;  %v831_v32 = vpop.permute.xlu1 %830 }
 0x48a   :  { %v836_v41 = vsel %vm690_vm3, %v831_v32, 0  ;;  %v1176_v32 = vsel %vm690_vm3, %v1076_v30, 0 }
 0x48b   :  { %v2148_v22 = vpop.eup %1820 }
 0x48c   :  { %v649_v23 = vsel %vm199_vm2, %v2148_v22, 0.0 }
 0x48d   :  { %650 = vadd.xlane.f32.xlu1 %v649_v23 }
 0x493   :  { %v2152_v24 = vpop.eup %1822 }
 0x494   :  { %v655_v25 = vsel %vm199_vm2, %v2152_v24, 0.0  ;;  %v2162_v34 = vpop.eup %1824 }
 0x495   :  { %656 = vadd.xlane.f32.xlu1 %v655_v25  ;;  %v2166_v31 = vpop.eup %1826 }
 0x49f   :  { %926 = vrot.lane.b32.xlu0 %v2049_v47, %s1957_s18  ;;  %v652_v47 = vsel %vm199_vm2, %v2162_v34, 0.0 }
 0x4a6   :  { %974 = vrot.lane.b32.xlu1 %v2058_v54, %s1957_s18  ;;  %v658_v54 = vsel %vm199_vm2, %v2166_v31, 0.0 }
 0x4b6   :  { %v642_v33 = vpop.xlane.xlu0 %641 }
 0x4b7   :  { %1828 = vrcp.f32 %v642_v33 }
 0x4ba   :  { %v639_v35 = vpop.xlane.xlu1 %638 }
 0x4bb   :  { %1830 = vrcp.f32 %v639_v35  ;;  %v1077_v35 = vld [vmem:[#allocation7 + $0xc] sm:$0xf] }
 0x4be   :  { %653 = vadd.xlane.f32.xlu0 %v652_v47  ;;  %v879_v49 = vpop.permute.xlu1 %878 }
 0x4bf   :  { %v884_v60 = vsel %vm690_vm3, %v879_v49, 0 }
 0x4c2   :  { %659 = vadd.xlane.f32.xlu0 %v658_v54 }
 0x4c4   :  { %v1829_v37 = vpop.eup %1828 }
 0x4c5   :  { %v670_v38 = vmul.f32 %v1829_v37, %v1813_v63  ;;  %v1223_v37 = vsel %vm690_vm3, %v1077_v35, 0 }
 0x4c7   :  { %v678_v39 = vpack.c.bf16 %v670_v38, %v670_v38 }
 0x4c8   :  { %v1831_v40 = vpop.eup %1830 }
 0x4c9   :  { %1675 = vmatmul.mubr.msk.bf16.vlgmr.msra.gmra.mxu0 %vm199_vm2, %v678_v39  ;;  %v669_v42 = vmul.f32 %v1831_v40, %v2132_v3 }
 0x4ca   :  { %1685 = vmatpush3.bf16.msra.mxu0 %v836_v41  ;;  %1686 = vmatprep.mubr.msk.bf16.mxu0 %vm1965_vm1, %v1964_v15 }
 0x4cb   :  { %v677_v43 = vpack.c.bf16 %v669_v42, %v669_v42  ;;  %1696 = vmatprep.subr.bf16.mxu0 %v1964_v15 }
 0x4cd   :  { %1669 = vmatmul.mubr.msk.bf16.vlgmr.msra.gmra.mxu1 %vm199_vm2, %v677_v43 }
 0x4ce   :  { %1679 = vmatpush3.bf16.msra.mxu1 %v788_v46  ;;  %1680 = vmatprep.mubr.msk.bf16.mxu1 %vm1965_vm1, %v1964_v15 }
 0x4cf   :  { %1690 = vmatprep.subr.bf16.mxu1 %v1964_v15 }
 0x4d8   :  { %1022 = vrot.lane.b32.xlu0 %v2056_v53, %s1957_s18 }
 0x50e   :  { %v645_v50 = vpop.xlane.xlu1 %644 }
 0x50f   :  { %1832 = vrcp.f32 %v645_v50 }
 0x512   :  { %v648_v51 = vpop.xlane.xlu0 %647 }
 0x513   :  { %1834 = vrcp.f32 %v648_v51 }
 0x516   :  { %v651_v52 = vpop.xlane.xlu1 %650  ;;  %v927_v61 = vpop.permute.xlu0 %926 }
 0x517   :  { %1836 = vrcp.f32 %v651_v52  ;;  %v932_v2 = vsel %vm690_vm3, %v927_v61, 0 }
 0x51c   :  { %v1833_v55 = vpop.eup %1832 }
 0x51d   :  { %v671_v56 = vmul.f32 %v1833_v55, %v2138_v16 }
 0x51e   :  { %v657_v57 = vpop.xlane.xlu1 %656 }
 0x51f   :  { %v679_v58 = vpack.c.bf16 %v671_v56, %v671_v56  ;;  %1838 = vrcp.f32 %v657_v57 }
 0x520   :  { %v1835_v59 = vpop.eup %1834 }
 0x521   :  { %1681 = vmatmul.mubr.msk.bf16.vlgmr.msra.gmra.mxu1 %vm199_vm2, %v679_v58  ;;  %v672_v53 = vmul.f32 %v1835_v59, %v2143_v20  ;;  %v1129_v20 = vsel %vm690_vm3, %v1075_v19, 0 }
 0x522   :  { %1691 = vmatpush3.bf16.msra.mxu1 %v884_v60  ;;  %1692 = vmatprep.mubr.msk.bf16.mxu1 %vm1965_vm1, %v1964_v15  ;;  %v975_v44 = vpop.permute.xlu1 %974 }
 0x523   :  { %v680_v62 = vpack.c.bf16 %v672_v53, %v672_v53  ;;  %1702 = vmatprep.subr.bf16.mxu1 %v1964_v15  ;;  %v980_v45 = vsel %vm690_vm3, %v975_v44, 0 }
 0x524   :  { %v1837_v63 = vpop.eup %1836 }
 0x525   :  { %1687 = vmatmul.mubr.msk.bf16.vlgmr.msra.gmra.mxu0 %vm199_vm2, %v680_v62  ;;  %v673_v3 = vmul.f32 %v1837_v63, %v2148_v22 }
 0x526   :  { %1697 = vmatpush3.bf16.msra.mxu0 %v932_v2  ;;  %1698 = vmatprep.mubr.msk.bf16.mxu0 %vm1965_vm1, %v1964_v15 }
 0x527   :  { %1708 = vmatprep.subr.bf16.mxu0 %v1964_v15  ;;  %v681_v36 = vpack.c.bf16 %v673_v3, %v673_v3 }
 0x529   :  { %1693 = vmatmul.mubr.msk.bf16.vlgmr.msra.gmra.mxu1 %vm199_vm2, %v681_v36 }
 0x52a   :  { %1703 = vmatpush3.bf16.msra.mxu1 %v980_v45  ;;  %1704 = vmatprep.mubr.msk.bf16.mxu1 %vm1965_vm1, %v1964_v15 }
 0x52b   :  { %1714 = vmatprep.subr.bf16.mxu1 %v1964_v15 }
 0x52c   :  { %v1839_v4 = vpop.eup %1838 }
 0x52d   :  { %v675_v6 = vmul.f32 %v1839_v4, %v2152_v24 }
 0x52f   :  { %v683_v7 = vpack.c.bf16 %v675_v6, %v675_v6 }
 0x531   :  { %1705 = vmatmul.mubr.msk.bf16.vlgmr.msra.gmra.mxu1 %vm199_vm2, %v683_v7 }
 0x532   :  { %1715 = vmatpush3.bf16.msra.mxu1 %v1082_v8  ;;  %1716 = vmatprep.mubr.msk.bf16.mxu1 %vm1965_vm1, %v1964_v15 }
 0x533   :  { %1726 = vmatprep.subr.bf16.mxu1 %v1964_v15 }
 0x547   :  { %v654_v9 = vpop.xlane.xlu0 %653 }
 0x548   :  { %1840 = vrcp.f32 %v654_v9 }
 0x54b   :  { %v660_v10 = vpop.xlane.xlu0 %659 }
 0x54c   :  { %1842 = vrcp.f32 %v660_v10 }
 0x54f   :  { %v1023_v13 = vpop.permute.xlu0 %1022 }
 0x550   :  { %v1028_v17 = vsel %vm690_vm3, %v1023_v13, 0 }
 0x555   :  { %v1841_v11 = vpop.eup %1840 }
 0x556   :  { %v674_v12 = vmul.f32 %v1841_v11, %v2162_v34 }
 0x558   :  { %v682_v14 = vpack.c.bf16 %v674_v12, %v674_v12 }
 0x559   :  { %v1843_v16 = vpop.eup %1842 }
 0x55a   :  { %1699 = vmatmul.mubr.msk.bf16.vlgmr.msra.gmra.mxu0 %vm199_vm2, %v682_v14  ;;  %v676_v48 = vmul.f32 %v1843_v16, %v2166_v31 }
 0x55b   :  { %1709 = vmatpush3.bf16.msra.mxu0 %v1028_v17  ;;  %1710 = vmatprep.mubr.msk.bf16.mxu0 %vm1965_vm1, %v1964_v15 }
 0x55c   :  { %1720 = vmatprep.subr.bf16.mxu0 %v1964_v15  ;;  %v684_v18 = vpack.c.bf16 %v676_v48, %v676_v48 }
 0x562   :  { %1711 = vmatmul.mubr.msk.bf16.vlgmr.msra.gmra.mxu0 %vm199_vm2, %v684_v18 }
 0x563   :  { %1722 = vmatprep.mubr.msk.bf16.mxu0 %vm1965_vm1, %v1964_v15  ;;  %1721 = vmatpush3.bf16.msra.mxu0 %v1129_v20 }
 0x564   :  { %1732 = vmatprep.subr.bf16.mxu0 %v1964_v15 }
 0x589   :  { %v776_v21 = vpop.f32.mrf.mxu0 }
 0x58b   :  { %v1676_v22 = vpop.f32.mrf.mxu0 }
 0x58c   :  { %v1541_v22 = vld [vmem:[#allocation8 + $0x1] ss:$0 sm:$0xff] }
 0x58d   :  { %v728_v23 = vpop.f32.mrf.mxu1  ;;  %v779_v24 = vpop.f32.mrf.mxu0 }
 0x58e   :  { %v1070_v25 = vpack.c.bf16 %v776_v21, %v728_v23 }
 0x58f   :  { %v1670_v26 = vpop.f32.mrf.mxu1  ;;  %v1677_v27 = vpop.f32.mrf.mxu0 }
 0x590   :  { %1717 = vmatmul.mubr.msk.bf16.vlgmr.msra.gmra.mxu1 %vm199_vm2, %v1070_v25 }
 0x591   :  { %v731_v28 = vpop.f32.mrf.mxu1  ;;  %1728 = vmatprep.mubr.msk.bf16.mxu1 %vm1965_vm1, %v1964_v15  ;;  %1727 = vmatpush3.bf16.msra.mxu1 %v1176_v32 }
 0x592   :  { %1738 = vmatprep.subr.bf16.mxu1 %v1964_v15 }
 0x593   :  { %v1671_v29 = vpop.f32.mrf.mxu1 }
 0x5e1   :  { %v824_v33 = vpop.f32.mrf.mxu1 }
 0x5e3   :  { %v1682_v34 = vpop.f32.mrf.mxu1 }
 0x5e5   :  { %v827_v47 = vpop.f32.mrf.mxu1  ;;  %v872_v31 = vpop.f32.mrf.mxu0 }
 0x5e6   :  { %v1071_v54 = vpack.c.bf16 %v872_v31, %v824_v33 }
 0x5e7   :  { %v1683_v38 = vpop.f32.mrf.mxu1  ;;  %v1688_v39 = vpop.f32.mrf.mxu0 }
 0x5e8   :  { %1723 = vmatmul.mubr.msk.bf16.vlgmr.msra.gmra.mxu0 %vm199_vm2, %v1071_v54 }
 0x5e9   :  { %v875_v40 = vpop.f32.mrf.mxu0  ;;  %1733 = vmatpush3.bf16.msra.mxu0 %v1223_v37  ;;  %1734 = vmatprep.mubr.msk.bf16.mxu0 %vm1965_vm1, %v1964_v15  ;;  %v920_v41 = vpop.f32.mrf.mxu1 }
 0x5ea   :  { %1746 = vmatprep.subr.bf16.mxu0 %v1964_v15 }
 0x5eb   :  { %v1689_v42 = vpop.f32.mrf.mxu0  ;;  %v1694_v43 = vpop.f32.mrf.mxu1 }
 0x5ed   :  { %v923_v46 = vpop.f32.mrf.mxu1 }
 0x5ee   :  { %v1798_v46 = vld [vmem:[#allocation5 + $0x18] sm:$0xff]  }
 0x5ef   :  { %v1695_v49 = vpop.f32.mrf.mxu1 }
 0x5f0   :  { %v1799_v49 = vld [vmem:[#allocation5 + $0x10] sm:$0xff]  }
 0x5f1   :  { %v1016_v50 = vpop.f32.mrf.mxu1 }
 0x5f3   :  { %v1706_v51 = vpop.f32.mrf.mxu1 }
 0x5f4   :  { %v1801_v51 = vld [vmem:[#allocation5 + $0x50] sm:$0xff]  }
 0x5f5   :  { %v1019_v52 = vpop.f32.mrf.mxu1 }
 0x5f6   :  { %v1802_v52 = vld [vmem:[#allocation5 + $0x48] sm:$0xff]  }
 0x5f7   :  { %v1707_v55 = vpop.f32.mrf.mxu1 }
 0x5f8   :  { %v1803_v55 = vld [vmem:[#allocation5 + $0x40] sm:$0xff]  }
 0x61a   :  { %v968_v56 = vpop.f32.mrf.mxu0 }
 0x61b   :  { %v1072_v57 = vpack.c.bf16 %v968_v56, %v920_v41  ;;  %v1804_v56 = vld [vmem:[#allocation5 + $0x38] sm:$0xff]  }
 0x61c   :  { %v1700_v58 = vpop.f32.mrf.mxu0 }
 0x61d   :  { %1729 = vmatmul.mubr.msk.bf16.vlgmr.msra.gmra.mxu1 %vm199_vm2, %v1072_v57 }
 0x61e   :  { %v971_v59 = vpop.f32.mrf.mxu0  ;;  %1742 = vmatprep.mubr.msk.bf16.mxu1 %vm1965_vm1, %v1964_v15  ;;  %1739 = vmatpush3.bf16.msra.mxu1 %v1798_v46 }
 0x61f   :  { %1740 = vmatprep.subr.bf16.mxu1 %v1964_v15 }
 0x620   :  { %v1701_v60 = vpop.f32.mrf.mxu0 }
 0x622   :  { %v1064_v53 = vpop.f32.mrf.mxu0  ;;  %1741 = vmatpush3.bf16.msra.mxu1 %v1799_v49 }
 0x623   :  { %v1073_v61 = vpack.c.bf16 %v1064_v53, %v1016_v50  ;;  %v1800_v50 = vld [vmem:[#allocation5 + $0x58] sm:$0xff]  }
 0x624   :  { %v1712_v62 = vpop.f32.mrf.mxu0 }
 0x625   :  { %1735 = vmatmul.mubr.msk.bf16.vlgmr.msra.gmra.mxu0 %vm199_vm2, %v1073_v61 }
 0x626   :  { %v1067_v63 = vpop.f32.mrf.mxu0  ;;  %1762 = vmatprep.mubr.msk.bf16.mxu0 %vm1965_vm1, %v1964_v15  ;;  %1747 = vmatpush3.bf16.msra.mxu0 %v1800_v50 }
 0x627   :  { %1748 = vmatprep.subr.bf16.mxu0 %v1964_v15 }
 0x628   :  { %v1713_v2 = vpop.f32.mrf.mxu0 }
 0x62a   :  { %1749 = vmatpush3.bf16.msra.mxu0 %v1801_v51 }
 0x62b   :  { %1750 = vmatprep.subr.bf16.mxu0 %v1964_v15 }
 0x62e   :  { %1751 = vmatpush3.bf16.msra.mxu0 %v1802_v52 }
 0x62f   :  { %1752 = vmatprep.subr.bf16.mxu0 %v1964_v15 }
 0x632   :  { %1753 = vmatpush3.bf16.msra.mxu0 %v1803_v55 }
 0x633   :  { %1754 = vmatprep.subr.bf16.mxu0 %v1964_v15 }
 0x636   :  { %1755 = vmatpush3.bf16.msra.mxu0 %v1804_v56 }
 0x637   :  { %1756 = vmatprep.subr.bf16.mxu0 %v1964_v15 }
 0x650   :  { %v1118_v3 = vpop.f32.mrf.mxu1 }
 0x651   :  { %v1266_v12 = vsel %vm74_vm0, %v1118_v3, 0.0 }
 0x652   :  { %v1718_v44 = vpop.f32.mrf.mxu1 }
 0x654   :  { %v1121_v36 = vpop.f32.mrf.mxu1 }
 0x655   :  { %v1273_v19 = vsel %vm74_vm0, %v1121_v36, 0.0  ;;  %v1805_v36 = vld [vmem:[#allocation5 + $0x30] sm:$0xff]  }
 0x656   :  { %v1719_v45 = vpop.f32.mrf.mxu1  ;;  %1757 = vmatpush3.bf16.msra.mxu0 %v1805_v36 }
 0x657   :  { %1758 = vmatprep.subr.bf16.mxu0 %v1964_v15  ;;  %v1806_v45 = vld [vmem:[#allocation5 + $0x28] sm:$0xff]  }
 0x65a   :  { %1759 = vmatpush3.bf16.msra.mxu0 %v1806_v45 }
 0x65b   :  { %1760 = vmatprep.subr.bf16.mxu0 %v1964_v15 }
 0x6a8   :  { %v1165_v4 = vpop.f32.mrf.mxu0 }
 0x6a9   :  { %v1267_v10 = vsel %vm74_vm0, %v1165_v4, 0.0  ;;  %v1807_v4 = vld [vmem:[#allocation5 + $0x20] sm:$0xff]  }
 0x6aa   :  { %v1724_v5 = vpop.f32.mrf.mxu0  ;;  %v1268_v14 = vadd.f32 %v1267_v10, %v1266_v12  ;;  %1761 = vmatpush3.bf16.msra.mxu0 %v1807_v4 }
 0x6ab   :  { %v1542_v5 = vld [vmem:[#allocation8 + $0x2] ss:$0 sm:$0xff] }
 0x6ac   :  { %v1168_v6 = vpop.f32.mrf.mxu0 }
 0x6ad   :  { %v1274_v17 = vsel %vm74_vm0, %v1168_v6, 0.0 }
 0x6ae   :  { %v1725_v7 = vpop.f32.mrf.mxu0  ;;  %v1275_v23 = vadd.f32 %v1274_v17, %v1273_v19 }
 0x6dd   :  { %v1212_v8 = vpop.f32.mrf.mxu1 }
 0x6de   :  { %v1269_v13 = vsel %vm74_vm0, %v1212_v8, 0.0 }
 0x6df   :  { %v1730_v9 = vpop.f32.mrf.mxu1  ;;  %v1270_v48 = vadd.f32 %v1269_v13, %v1268_v14 }
 0x6e1   :  { %v1215_v11 = vpop.f32.mrf.mxu1 }
 0x6e2   :  { %v1276_v20 = vsel %vm74_vm0, %v1215_v11, 0.0 }
 0x6e3   :  { %v1731_v16 = vpop.f32.mrf.mxu1  ;;  %v1277_v26 = vadd.f32 %v1276_v20, %v1275_v23 }
 0x6e4   :  { %v1546_v16 = vld [vmem:[#allocation8 + $0x3] ss:$0 sm:$0xff] }
 0x6e5   :  { %v1259_v18 = vpop.f32.mrf.mxu0 }
 0x6e6   :  { %v1271_v21 = vsel %vm74_vm0, %v1259_v18, 0.0 }
 0x6e7   :  { %v1272_v24 = vadd.f32 %v1271_v21, %v1270_v48  ;;  %v1736_v25 = vpop.f32.mrf.mxu0 }
 0x6e9   :  { %v1285_v27 = vadd.f32 %v1541_v22, %v1272_v24  ;;  %v1262_v28 = vpop.f32.mrf.mxu0 }
 0x6ea   :  { %v1278_v29 = vsel %vm74_vm0, %v1262_v28, 0.0 }
 0x6eb   :  { %v1279_v30 = vadd.f32 %v1278_v29, %v1277_v26  ;;  %v1737_v32 = vpop.f32.mrf.mxu0  ;;  %v2244_v33 = vadd.f32 %v1285_v27, %v2017_v0 }
 0x6ed   :  { %v1286_v34 = vadd.f32 %v1541_v22, %v1279_v30  ;;  %v1289_v35 = vsel %vm74_vm0, %v2244_v33, 0.0 }
 0x6ee   :  { %1290 = vadd.xlane.f32.xlu1 %v1289_v35 }
 0x6ef   :  { %v2249_v47 = vadd.f32 %v1286_v34, %v2019_v1 }
 0x6f1   :  { %v1292_v31 = vsel %vm74_vm0, %v2249_v47, 0.0 }
 0x6f2   :  { %1293 = vadd.xlane.f32.xlu0 %v1292_v31 }
 0x777   :  { %v1291_v54 = vpop.xlane.xlu1 %1290 }
 0x778   :  { %v1295_v37 = vmul.f32 0.03125, %v1291_v54 }
 0x77a   :  { %v1297_v38 = vsub.f32 %v2244_v33, %v1295_v37 }
 0x77b   :  { %v1294_v39 = vpop.xlane.xlu0 %1293 }
 0x77c   :  { %v1296_v40 = vmul.f32 0.03125, %v1294_v39  ;;  %v1299_v0 = vmul.f32 %v1297_v38, %v1297_v38 }
 0x77e   :  { %v1298_v41 = vsub.f32 %v2249_v47, %v1296_v40  ;;  %v1301_v42 = vsel %vm74_vm0, %v1299_v0, 0.0 }
 0x77f   :  { %1302 = vadd.xlane.f32.xlu0 %v1301_v42 }
 0x780   :  { %v1300_v43 = vmul.f32 %v1298_v41, %v1298_v41 }
 0x782   :  { %v1304_v1 = vsel %vm74_vm0, %v1300_v43, 0.0 }
 0x783   :  { %1305 = vadd.xlane.f32.xlu0 %v1304_v1 }
 0x808   :  { %v1303_v57 = vpop.xlane.xlu0 %1302 }
 0x809   :  { %v1307_v58 = vmul.f32 0.03125, %v1303_v57 }
 0x80b   :  { %v1309_v59 = vadd.f32 1e-06, %v1307_v58 }
 0x80c   :  { %v1306_v60 = vpop.xlane.xlu0 %1305 }
 0x80d   :  { %v1308_v53 = vmul.f32 0.03125, %v1306_v60  ;;  %1844 = vrsqrt.f32 %v1309_v59 }
 0x80f   :  { %v1310_v61 = vadd.f32 1e-06, %v1308_v53 }
 0x811   :  { %1846 = vrsqrt.f32 %v1310_v61 }
 0x81a   :  { %v1845_v62 = vpop.eup %1844 }
 0x81b   :  { %v1313_v2 = vmul.f32 %v1845_v62, %v1297_v38 }
 0x81e   :  { %v1847_v63 = vpop.eup %1846 }
 0x81f   :  { %v1314_v3 = vmul.f32 %v1847_v63, %v1298_v41 }
 0x821   :  { %v1315_v44 = vpack.c.bf16 %v1314_v3, %v1313_v2 }
 0x823   :  { %1743 = vmatmul.mubr.msk.bf16.vlgmr.msra.gmra.mxu1 %vm74_vm0, %v1315_v44 }
 0x8e3   :  { %v1374_v6 = vpop.f32.mrf.mxu1 }
 0x8e4   :  { %v1375_v8 = vadd.f32 %v1542_v5, %v1374_v6 }
 0x8e5   :  { %v1744_v7 = vpop.f32.mrf.mxu1 }
 0x8e6   :  { %v1381_v12 = vmax.f32 %v1375_v8, 0.0 }
 0x8e7   :  { %v1377_v9 = vpop.f32.mrf.mxu1 }
 0x8e8   :  { %v1378_v10 = vadd.f32 %v1542_v5, %v1377_v9 }
 0x8e9   :  { %v1745_v11 = vpop.f32.mrf.mxu1 }
 0x8ea   :  { %v1382_v13 = vmax.f32 %v1378_v10, 0.0 }
 0x8ec   :  { %v1383_v14 = vpack.c.bf16 %v1382_v13, %v1381_v12 }
 0x8ee   :  { %1763 = vmatmul.mubr.bf16.vlgmr.msra.gmra.mxu0 %v1383_v14 }
 0x9ae   :  { %v1487_v17 = vpop.f32.mrf.mxu0 }
 0x9af   :  { %v1488_v48 = vadd.f32 %v1546_v16, %v1487_v17 }
 0x9b0   :  { %v1764_v18 = vpop.f32.mrf.mxu0 }
 0x9b1   :  { %v1494_v19 = vadd.f32 %v1488_v48, %v2244_v33 }
 0x9b2   :  { %v1490_v15 = vpop.f32.mrf.mxu0 }
 0x9b3   :  { %1496 = vst.msk [vmem:[#allocation10] sm:$0xff] %vm74_vm0, %v1494_v19  ;;  %v1491_v20 = vadd.f32 %v1546_v16, %v1490_v15 }
 0x9b4   :  { %v1765_v21 = vpop.f32.mrf.mxu0 }
 0x9b5   :  { %v1495_v22 = vadd.f32 %v1491_v20, %v2249_v47 }
 0x9b7   :  { %1497 = vst.msk [vmem:[#allocation10 + $0x8] sm:$0xff] %vm74_vm0, %v1495_v22 }
 0x9b8   :  { %1939 = shalt.err (!%p1936_p10)
}
 0x9b9   :  { %1509 = dma.vmem_to_hbm [thread:$0]  %s1504_s14, 256, %s2280_s4, [#allocation4], %s1960_s25, %s1960_s25, %s1961_s26  }
 0x9ba   :  { %1954 = dma.done.wait [#allocation4], 256  }
 0x9bb   :  { %1955 = vsyncadd [#allocation4], 4294967040 }
 0x9bc   :  { %1513 = vsyncpa [#allocation3], 1 }
 0x9bd   :  { %1514 = vsyncpa [#allocation6], 1 }
 0x9be   :  { %1515 = vsyncpa [#allocation9], 1 }
 0x9bf   :  { %1516 = vsyncpa [#allocation4], 1 }

</bundles_post_ra>
